<compile_context>
chip_gen: v7x
topology: tpu7x:2x2x1
jax: 0.10.0
libtpu: 0.0.40
codegen_flags: <defaults>
</compile_context>

<pallas_src>
import jax
import jax.numpy as jnp
from jax.experimental import pallas as pl
from jax.experimental.pallas import tpu as pltpu

# ---------------- configuration (small synthetic shapes) ----------------
B = 2            # batch
C = 4            # image channels
H = W = 16       # image spatial
PATCH = 8        # patch size (conv kernel == stride)
NP = (H // PATCH) * (W // PATCH)       # 4 patches per image
DP = C * PATCH * PATCH                 # 256 patch dim
HV = 32          # vision hidden
HT = 32          # text hidden
S = 8            # text sequence length
VOCAB = 64
PROJ = 32        # projection dim
NUM_CLASSES = 4
LANES = 128      # lane-dense padded logits width
EPS = 1e-5

BP = 8           # sublane-padded batch rows (full (8,128) output tile)
BS = B * S       # 16 flattened tokens
BNP = B * NP     # 8 flattened patches

# ---- slab A (width HV=32) row layout, packed once at param-prep time ----
R_WPATCH = 0                      # [0,256)   w_patch  (DP, HV)
R_TOKEMB = DP                     # [256,320) tok_emb  (VOCAB, HT)
R_POS = R_TOKEMB + VOCAB          # [320,336) pos_emb tiled (B*S, HT)
R_SMALL = R_POS + BS              # [336,344) b_patch, ln_v_g/b, ln_t_g/b (+pad)
R_VPOOL = R_SMALL + 8             # [344,352) vision pooling matrix (BP, B*NP)
ROWS_A = R_VPOOL + BP             # 352

# ---- slab B (width 192) layout ----
ROWS_B = 2 * PROJ + 1             # 65: 64 weight rows + 1 bias row
WIDTH_B = LANES + 2 * PROJ        # 192: [0,128) padded head, [128,192) blk-diag proj


# ---------------------------- kernel helpers ------------------------------
def _layernorm(x, g, b):
    mu = jnp.mean(x, axis=-1, keepdims=True)
    var = jnp.mean((x - mu) ** 2, axis=-1, keepdims=True)
    return (x - mu) * jax.lax.rsqrt(var + EPS) * g + b


# ---------------------------- Pallas kernel ------------------------------
def _fused_kernel(patches_ref, ids_ref, pool_t_ref, slab_a_ref, slab_b_ref, out_ref):
    # -- unpack constant slabs (static row/lane slices; no extra DMAs) --
    w_patch = slab_a_ref[R_WPATCH:R_WPATCH + DP, :]            # (DP, HV)
    tok_emb = slab_a_ref[R_TOKEMB:R_TOKEMB + VOCAB, :]         # (VOCAB, HT)
    pos = slab_a_ref[R_POS:R_POS + BS, :]                      # (B*S, HT)
    smalls = slab_a_ref[R_SMALL:R_SMALL + 8, :]                # (8, HV), one tile
    b_patch = smalls[0:1, :]
    g_v = smalls[1:2, :]
    b_v = smalls[2:3, :]
    g_t = smalls[3:4, :]
    b_t = smalls[4:5, :]
    v_pool = slab_a_ref[R_VPOOL:R_VPOOL + BP, 0:BNP]           # (BP, B*NP), 1/NP folded

    w_head = slab_b_ref[0:2 * PROJ, 0:LANES]                   # (64, 128) zero-padded
    b_head = slab_b_ref[2 * PROJ:2 * PROJ + 1, 0:LANES]        # (1, 128)
    w_proj = slab_b_ref[0:2 * PROJ, LANES:LANES + 2 * PROJ]    # (64, 64) block-diag

    # -------- vision branch: all images in one batched pass --------
    feats = jnp.dot(patches_ref[...], w_patch,
                    preferred_element_type=jnp.float32) + b_patch         # (B*NP, HV)
    v_pooled = jnp.dot(v_pool, feats, preferred_element_type=jnp.float32)  # (BP, HV)
    v_norm = _layernorm(v_pooled, g_v, b_v)

    # -------- text branch: in-kernel one-hot embedding gather --------
    # TODO(synk): at realistic vocab sizes switch to a scalar-prefetch row
    # gather (PrefetchScalarGridSpec + pl.Element index_map) instead of the
    # O(B*S*VOCAB) one-hot matmul.
    onehot = (jax.lax.broadcasted_iota(jnp.int32, (BS, VOCAB), 1)
              == ids_ref[...]).astype(jnp.float32)                        # (B*S, VOCAB)
    tok = jnp.dot(onehot, tok_emb,
                  preferred_element_type=jnp.float32) + pos               # (B*S, HT)
    t_pooled = jnp.dot(pool_t_ref[...], tok,
                       preferred_element_type=jnp.float32)                # (BP, HT)
    t_norm = _layernorm(t_pooled, g_t, b_t)

    # -------- fused block-diagonal projections + per-half L2 normalize --------
    both = jnp.concatenate([v_norm, t_norm], axis=1)                      # (BP, 64)
    proj = jnp.dot(both, w_proj, preferred_element_type=jnp.float32)      # (BP, 64)
    img = proj[:, :PROJ]
    txt = proj[:, PROJ:]
    # Note: rsqrt(max(sumsq, 1e-12)) guards near-zero embeddings (reference
    # divides by the raw norm; only differs for degenerate inputs).
    img = img * jax.lax.rsqrt(
        jnp.maximum(jnp.sum(img * img, axis=-1, keepdims=True), 1e-12))
    txt = txt * jax.lax.rsqrt(
        jnp.maximum(jnp.sum(txt * txt, axis=-1, keepdims=True), 1e-12))
    combined = jnp.concatenate([img, txt], axis=1)                        # (BP, 2*PROJ)

    # -------- classification head: torch.cat([img, txt], 1) @ W + b --------
    out_ref[...] = (jnp.dot(combined, w_head,
                            preferred_element_type=jnp.float32) + b_head)  # (BP, 128)


# ------------------------ one-time parameter packing ----------------------
def pack_params(params):
    """Pack all constant tensors into two VMEM slabs (done ONCE, not per call).
    Cuts kernel input DMAs from 15 to 5 and hoists head padding / pos tiling
    out of the forward wrapper."""
    slab_a = jnp.zeros((ROWS_A, HV), jnp.float32)
    slab_a = slab_a.at[R_WPATCH:R_WPATCH + DP].set(params["w_patch"])
    slab_a = slab_a.at[R_TOKEMB:R_TOKEMB + VOCAB].set(params["tok_emb"])
    slab_a = slab_a.at[R_POS:R_POS + BS].set(jnp.tile(params["pos_emb"], (B, 1)))
    slab_a = slab_a.at[R_SMALL + 0].set(params["b_patch"][0])
    slab_a = slab_a.at[R_SMALL + 1].set(params["ln_v_g"][0])
    slab_a = slab_a.at[R_SMALL + 2].set(params["ln_v_b"][0])
    slab_a = slab_a.at[R_SMALL + 3].set(params["ln_t_g"][0])
    slab_a = slab_a.at[R_SMALL + 4].set(params["ln_t_b"][0])
    # vision mean-pool matrix with the 1/NP scale folded in (block-diagonal)
    v_w = jnp.full((B, NP), 1.0 / NP, jnp.float32)
    v_pool = (jnp.eye(B, dtype=jnp.float32)[:, :, None] * v_w[:, None, :]
              ).reshape(B, BNP)
    slab_a = slab_a.at[R_VPOOL:R_VPOOL + B, 0:BNP].set(v_pool)

    slab_b = jnp.zeros((ROWS_B, WIDTH_B), jnp.float32)
    slab_b = slab_b.at[0:2 * PROJ, 0:NUM_CLASSES].set(params["w_head"])
    slab_b = slab_b.at[2 * PROJ, 0:NUM_CLASSES].set(params["b_head"][0])
    slab_b = slab_b.at[0:PROJ, LANES:LANES + PROJ].set(params["w_vproj"])
    slab_b = slab_b.at[PROJ:2 * PROJ,
                       LANES + PROJ:LANES + 2 * PROJ].set(params["w_tproj"])
    return {"slab_a": slab_a, "slab_b": slab_b}


# ------------------------------ forward -----------------------------------
def _forward_impl(pixel_values, input_ids, attention_mask, packed):
    b = pixel_values.shape[0]
    # im2col for Conv2d(kernel=stride=PATCH) — pure layout glue.
    # TODO(synk): at realistic image sizes fold this into an in-kernel strided
    # DMA (memory_space=pl.ANY + make_async_copy); size double-buffered patch
    # tiles for v7x's 64 MiB VMEM (<= ~8 MiB per tile), not v6e's 128 MiB.
    patches = (pixel_values
               .reshape(b, C, H // PATCH, PATCH, W // PATCH, PATCH)
               .transpose(0, 2, 4, 1, 3, 5)
               .reshape(b * NP, DP)).astype(jnp.float32)

    ids_flat = input_ids.reshape(b * S, 1).astype(jnp.int32)

    # Mask-weighted mean pooling folded into a block-diagonal pooling matrix;
    # the denominator (and its all-zero-row guard) is computed here, outside
    # the kernel hot path.
    mask_f = attention_mask.astype(jnp.float32)                         # (B, S)
    w = mask_f / jnp.maximum(mask_f.sum(-1, keepdims=True), 1e-6)       # (B, S)
    pool_t = (jnp.eye(b, dtype=jnp.float32)[:, :, None] * w[:, None, :]
              ).reshape(b, b * S)
    pool_t = jnp.pad(pool_t, ((0, BP - b), (0, 0)))                     # (BP, B*S)

    vmem = pl.BlockSpec(memory_space=pltpu.MemorySpace.VMEM)
    out = pl.pallas_call(
        _fused_kernel,
        out_shape=jax.ShapeDtypeStruct((BP, LANES), jnp.float32),
        in_specs=[vmem] * 5,
        out_specs=vmem,
    )(patches, ids_flat, pool_t, packed["slab_a"], packed["slab_b"])
    return out[:b, :NUM_CLASSES]


vision_text_classify = jax.jit(_forward_impl)


# ------------------------ pure-JAX reference ------------------------------
def reference_forward(pixel_values, input_ids, attention_mask, params):
    b, c, h, w = pixel_values.shape
    patches = (pixel_values
               .reshape(b, c, h // PATCH, PATCH, w // PATCH, PATCH)
               .transpose(0, 2, 4, 1, 3, 5)
               .reshape(b, NP, DP)).astype(jnp.float32)
    feats = patches @ params["w_patch"] + params["b_patch"]
    v_pooled = feats.mean(axis=1)
    mu = v_pooled.mean(-1, keepdims=True)
    var = ((v_pooled - mu) ** 2).mean(-1, keepdims=True)
    v_norm = (v_pooled - mu) / jnp.sqrt(var + EPS) * params["ln_v_g"] + params["ln_v_b"]
    img = v_norm @ params["w_vproj"]
    img = img / jnp.linalg.norm(img, axis=-1, keepdims=True)

    tok = params["tok_emb"][input_ids] + params["pos_emb"][None]
    mask = attention_mask.astype(jnp.float32)[:, :, None]
    t_pooled = (tok * mask).sum(1) / mask.sum(1)
    mu_t = t_pooled.mean(-1, keepdims=True)
    var_t = ((t_pooled - mu_t) ** 2).mean(-1, keepdims=True)
    t_norm = (t_pooled - mu_t) / jnp.sqrt(var_t + EPS) * params["ln_t_g"] + params["ln_t_b"]
    txt = t_norm @ params["w_tproj"]
    txt = txt / jnp.linalg.norm(txt, axis=-1, keepdims=True)

    combined = jnp.concatenate([img, txt], axis=1)     # torch.cat(..., dim=1)
    return combined @ params["w_head"] + params["b_head"]


# ------------------------------- main -------------------------------------
def make_params(key):
    ks = jax.random.split(key, 8)
    return {
        "w_patch": jax.random.normal(ks[0], (DP, HV), jnp.float32) * 0.02,
        "b_patch": jnp.zeros((1, HV), jnp.float32),
        "ln_v_g": jnp.ones((1, HV), jnp.float32),
        "ln_v_b": jnp.zeros((1, HV), jnp.float32),
        "w_vproj": jax.random.normal(ks[1], (HV, PROJ), jnp.float32) * 0.05,
        "tok_emb": jax.random.normal(ks[2], (VOCAB, HT), jnp.float32) * 0.02,
        "pos_emb": jax.random.normal(ks[3], (S, HT), jnp.float32) * 0.02,
        "ln_t_g": jnp.ones((1, HT), jnp.float32),
        "ln_t_b": jnp.zeros((1, HT), jnp.float32),
        "w_tproj": jax.random.normal(ks[4], (HT, PROJ), jnp.float32) * 0.05,
        "w_head": jax.random.normal(ks[5], (2 * PROJ, NUM_CLASSES), jnp.float32) * 0.1,
        "b_head": jnp.zeros((1, NUM_CLASSES), jnp.float32),
    }


if __name__ == "__main__":
    key = jax.random.PRNGKey(0)
    k_px, k_ids, k_params = jax.random.split(key, 3)

    pixel_values = jax.random.normal(k_px, (B, C, H, W), jnp.float32)   # NCHW
    input_ids = jax.random.randint(k_ids, (B, S), 0, VOCAB, jnp.int32)
    attention_mask = jnp.ones((B, S), jnp.int32).at[1, S - 2:].set(0)   # ragged mask
    params = make_params(k_params)
    packed = pack_params(params)   # one-time packing (hoisted out of forward)

    logits = vision_text_classify(pixel_values, input_ids, attention_mask, packed)
    logits = jax.block_until_ready(logits)

    ref = reference_forward(pixel_values, input_ids, attention_mask, params)
    assert logits.shape == (B, NUM_CLASSES)
    assert jnp.allclose(logits, ref, atol=1e-4, rtol=1e-4), (logits, ref)

    # TODO(synk): the injected vision_text_model in the original repo is a full
    # transformer dual-encoder; here it is a faithful but shallow CLIP-style
    # encoder (patch-embed / token-embed + pool + LN + projection + L2 norm).
    print("KERNEL_OK")
</pallas_src>

<mosaic_0001>
module attributes {stable_mosaic.version = 11 : i64} {
  func.func @_fused_kernel(%arg0: memref<8x256xf32, #tpu.memory_space<vmem>>, %arg1: memref<16x1xi32, #tpu.memory_space<vmem>>, %arg2: memref<8x16xf32, #tpu.memory_space<vmem>>, %arg3: memref<352x32xf32, #tpu.memory_space<vmem>>, %arg4: memref<65x192xf32, #tpu.memory_space<vmem>>, %arg5: memref<8x128xf32, #tpu.memory_space<vmem>>) attributes {dimension_semantics = [], scalar_prefetch = 0 : i64, scratch_operands = 0 : i64, tpu.core_type = #tpu.core_type<tc>} {
    %c0 = arith.constant 0 : index
    %c0_0 = arith.constant 0 : index
    %0 = vector.load %arg3[%c0, %c0_0] : memref<352x32xf32, #tpu.memory_space<vmem>>, vector<256x32xf32>
    %c256 = arith.constant 256 : index
    %c0_1 = arith.constant 0 : index
    %1 = vector.load %arg3[%c256, %c0_1] : memref<352x32xf32, #tpu.memory_space<vmem>>, vector<64x32xf32>
    %c320 = arith.constant 320 : index
    %c0_2 = arith.constant 0 : index
    %2 = vector.load %arg3[%c320, %c0_2] : memref<352x32xf32, #tpu.memory_space<vmem>>, vector<16x32xf32>
    %c336 = arith.constant 336 : index
    %c0_3 = arith.constant 0 : index
    %3 = vector.load %arg3[%c336, %c0_3] : memref<352x32xf32, #tpu.memory_space<vmem>>, vector<8x32xf32>
    %4 = vector.extract_strided_slice %3 {offsets = [0, 0], sizes = [1, 32], strides = [1, 1]} : vector<8x32xf32> to vector<1x32xf32>
    %5 = vector.extract_strided_slice %3 {offsets = [1, 0], sizes = [1, 32], strides = [1, 1]} : vector<8x32xf32> to vector<1x32xf32>
    %6 = vector.extract_strided_slice %3 {offsets = [2, 0], sizes = [1, 32], strides = [1, 1]} : vector<8x32xf32> to vector<1x32xf32>
    %7 = vector.extract_strided_slice %3 {offsets = [3, 0], sizes = [1, 32], strides = [1, 1]} : vector<8x32xf32> to vector<1x32xf32>
    %8 = vector.extract_strided_slice %3 {offsets = [4, 0], sizes = [1, 32], strides = [1, 1]} : vector<8x32xf32> to vector<1x32xf32>
    %c344 = arith.constant 344 : index
    %c0_4 = arith.constant 0 : index
    %9 = vector.load %arg3[%c344, %c0_4] : memref<352x32xf32, #tpu.memory_space<vmem>>, vector<8x8xf32>
    %c0_5 = arith.constant 0 : index
    %c0_6 = arith.constant 0 : index
    %10 = vector.load %arg4[%c0_5, %c0_6] : memref<65x192xf32, #tpu.memory_space<vmem>>, vector<64x128xf32>
    %c64 = arith.constant 64 : index
    %c0_7 = arith.constant 0 : index
    %11 = vector.load %arg4[%c64, %c0_7] : memref<65x192xf32, #tpu.memory_space<vmem>>, vector<1x128xf32>
    %c0_8 = arith.constant 0 : index
    %c128 = arith.constant 128 : index
    %12 = vector.load %arg4[%c0_8, %c128] : memref<65x192xf32, #tpu.memory_space<vmem>>, vector<64x64xf32>
    %c0_9 = arith.constant 0 : index
    %c0_10 = arith.constant 0 : index
    %13 = vector.load %arg0[%c0_9, %c0_10] : memref<8x256xf32, #tpu.memory_space<vmem>>, vector<8x256xf32>
    %cst = arith.constant dense<0.000000e+00> : vector<8x32xf32>
    %14 = tpu.matmul %13, %0, %cst {dimension_numbers = #tpu.dot_dimension_numbers<[1], [0], [0], [1], [0, 0, 1, 1], [], []>} : vector<8x256xf32>, vector<256x32xf32>, vector<8x32xf32> -> vector<8x32xf32>
    %15 = vector.broadcast %4 : vector<1x32xf32> to vector<8x32xf32>
    %16 = arith.addf %14, %15 : vector<8x32xf32>
    %cst_11 = arith.constant dense<0.000000e+00> : vector<8x32xf32>
    %17 = tpu.matmul %9, %16, %cst_11 {dimension_numbers = #tpu.dot_dimension_numbers<[1], [0], [0], [1], [0, 0, 1, 1], [], []>} : vector<8x8xf32>, vector<8x32xf32>, vector<8x32xf32> -> vector<8x32xf32>
    %cst_12 = arith.constant dense<0.000000e+00> : vector<8xf32>
    %18 = vector.multi_reduction <add>, %17, %cst_12 [1] : vector<8x32xf32> to vector<8xf32>
    %19 = vector.shape_cast %18 : vector<8xf32> to vector<8x1xf32>
    %cst_13 = arith.constant 3.200000e+01 : f32
    %20 = vector.broadcast %cst_13 : f32 to vector<8x1xf32>
    %21 = arith.divf %19, %20 : vector<8x1xf32>
    %22 = vector.broadcast %21 : vector<8x1xf32> to vector<8x32xf32>
    %23 = arith.subf %17, %22 : vector<8x32xf32>
    %24 = arith.mulf %23, %23 : vector<8x32xf32>
    %cst_14 = arith.constant dense<0.000000e+00> : vector<8xf32>
    %25 = vector.multi_reduction <add>, %24, %cst_14 [1] : vector<8x32xf32> to vector<8xf32>
    %26 = vector.shape_cast %25 : vector<8xf32> to vector<8x1xf32>
    %cst_15 = arith.constant 3.200000e+01 : f32
    %27 = vector.broadcast %cst_15 : f32 to vector<8x1xf32>
    %28 = arith.divf %26, %27 : vector<8x1xf32>
    %29 = vector.broadcast %21 : vector<8x1xf32> to vector<8x32xf32>
    %30 = arith.subf %17, %29 : vector<8x32xf32>
    %cst_16 = arith.constant 9.99999974E-6 : f32
    %31 = vector.broadcast %cst_16 : f32 to vector<8x1xf32>
    %32 = arith.addf %28, %31 : vector<8x1xf32>
    %33 = math.rsqrt %32 : vector<8x1xf32>
    %34 = vector.broadcast %33 : vector<8x1xf32> to vector<8x32xf32>
    %35 = arith.mulf %30, %34 : vector<8x32xf32>
    %36 = vector.broadcast %5 : vector<1x32xf32> to vector<8x32xf32>
    %37 = arith.mulf %35, %36 : vector<8x32xf32>
    %38 = vector.broadcast %6 : vector<1x32xf32> to vector<8x32xf32>
    %39 = arith.addf %37, %38 : vector<8x32xf32>
    %40 = tpu.iota {dimensions = array<i32: 1>} : vector<16x64xi32>
    %c0_17 = arith.constant 0 : index
    %c0_18 = arith.constant 0 : index
    %41 = vector.load %arg1[%c0_17, %c0_18] : memref<16x1xi32, #tpu.memory_space<vmem>>, vector<16x1xi32>
    %42 = vector.broadcast %41 : vector<16x1xi32> to vector<16x64xi32>
    %43 = arith.cmpi eq, %40, %42 : vector<16x64xi32>
    %44 = arith.extui %43 : vector<16x64xi1> to vector<16x64xi32>
    %45 = arith.sitofp %44 : vector<16x64xi32> to vector<16x64xf32>
    %cst_19 = arith.constant dense<0.000000e+00> : vector<16x32xf32>
    %46 = tpu.matmul %45, %1, %cst_19 {dimension_numbers = #tpu.dot_dimension_numbers<[1], [0], [0], [1], [0, 0, 1, 1], [], []>} : vector<16x64xf32>, vector<64x32xf32>, vector<16x32xf32> -> vector<16x32xf32>
    %47 = arith.addf %46, %2 : vector<16x32xf32>
    %c0_20 = arith.constant 0 : index
    %c0_21 = arith.constant 0 : index
    %48 = vector.load %arg2[%c0_20, %c0_21] : memref<8x16xf32, #tpu.memory_space<vmem>>, vector<8x16xf32>
    %cst_22 = arith.constant dense<0.000000e+00> : vector<8x32xf32>
    %49 = tpu.matmul %48, %47, %cst_22 {dimension_numbers = #tpu.dot_dimension_numbers<[1], [0], [0], [1], [0, 0, 1, 1], [], []>} : vector<8x16xf32>, vector<16x32xf32>, vector<8x32xf32> -> vector<8x32xf32>
    %cst_23 = arith.constant dense<0.000000e+00> : vector<8xf32>
    %50 = vector.multi_reduction <add>, %49, %cst_23 [1] : vector<8x32xf32> to vector<8xf32>
    %51 = vector.shape_cast %50 : vector<8xf32> to vector<8x1xf32>
    %cst_24 = arith.constant 3.200000e+01 : f32
    %52 = vector.broadcast %cst_24 : f32 to vector<8x1xf32>
    %53 = arith.divf %51, %52 : vector<8x1xf32>
    %54 = vector.broadcast %53 : vector<8x1xf32> to vector<8x32xf32>
    %55 = arith.subf %49, %54 : vector<8x32xf32>
    %56 = arith.mulf %55, %55 : vector<8x32xf32>
    %cst_25 = arith.constant dense<0.000000e+00> : vector<8xf32>
    %57 = vector.multi_reduction <add>, %56, %cst_25 [1] : vector<8x32xf32> to vector<8xf32>
    %58 = vector.shape_cast %57 : vector<8xf32> to vector<8x1xf32>
    %cst_26 = arith.constant 3.200000e+01 : f32
    %59 = vector.broadcast %cst_26 : f32 to vector<8x1xf32>
    %60 = arith.divf %58, %59 : vector<8x1xf32>
    %61 = vector.broadcast %53 : vector<8x1xf32> to vector<8x32xf32>
    %62 = arith.subf %49, %61 : vector<8x32xf32>
    %cst_27 = arith.constant 9.99999974E-6 : f32
    %63 = vector.broadcast %cst_27 : f32 to vector<8x1xf32>
    %64 = arith.addf %60, %63 : vector<8x1xf32>
    %65 = math.rsqrt %64 : vector<8x1xf32>
    %66 = vector.broadcast %65 : vector<8x1xf32> to vector<8x32xf32>
    %67 = arith.mulf %62, %66 : vector<8x32xf32>
    %68 = vector.broadcast %7 : vector<1x32xf32> to vector<8x32xf32>
    %69 = arith.mulf %67, %68 : vector<8x32xf32>
    %70 = vector.broadcast %8 : vector<1x32xf32> to vector<8x32xf32>
    %71 = arith.addf %69, %70 : vector<8x32xf32>
    %72 = tpu.concatenate %39, %71 in 1 : vector<8x32xf32>, vector<8x32xf32> -> vector<8x64xf32>
    %cst_28 = arith.constant dense<0.000000e+00> : vector<8x64xf32>
    %73 = tpu.matmul %72, %12, %cst_28 {dimension_numbers = #tpu.dot_dimension_numbers<[1], [0], [0], [1], [0, 0, 1, 1], [], []>} : vector<8x64xf32>, vector<64x64xf32>, vector<8x64xf32> -> vector<8x64xf32>
    %74 = vector.extract_strided_slice %73 {offsets = [0, 0], sizes = [8, 32], strides = [1, 1]} : vector<8x64xf32> to vector<8x32xf32>
    %75 = vector.extract_strided_slice %73 {offsets = [0, 32], sizes = [8, 32], strides = [1, 1]} : vector<8x64xf32> to vector<8x32xf32>
    %76 = arith.mulf %74, %74 : vector<8x32xf32>
    %cst_29 = arith.constant dense<0.000000e+00> : vector<8xf32>
    %77 = vector.multi_reduction <add>, %76, %cst_29 [1] : vector<8x32xf32> to vector<8xf32>
    %78 = vector.shape_cast %77 : vector<8xf32> to vector<8x1xf32>
    %cst_30 = arith.constant 9.99999996E-13 : f32
    %79 = vector.broadcast %cst_30 : f32 to vector<8x1xf32>
    %80 = arith.maximumf %78, %79 : vector<8x1xf32>
    %81 = math.rsqrt %80 : vector<8x1xf32>
    %82 = vector.broadcast %81 : vector<8x1xf32> to vector<8x32xf32>
    %83 = arith.mulf %74, %82 : vector<8x32xf32>
    %84 = arith.mulf %75, %75 : vector<8x32xf32>
    %cst_31 = arith.constant dense<0.000000e+00> : vector<8xf32>
    %85 = vector.multi_reduction <add>, %84, %cst_31 [1] : vector<8x32xf32> to vector<8xf32>
    %86 = vector.shape_cast %85 : vector<8xf32> to vector<8x1xf32>
    %cst_32 = arith.constant 9.99999996E-13 : f32
    %87 = vector.broadcast %cst_32 : f32 to vector<8x1xf32>
    %88 = arith.maximumf %86, %87 : vector<8x1xf32>
    %89 = math.rsqrt %88 : vector<8x1xf32>
    %90 = vector.broadcast %89 : vector<8x1xf32> to vector<8x32xf32>
    %91 = arith.mulf %75, %90 : vector<8x32xf32>
    %92 = tpu.concatenate %83, %91 in 1 : vector<8x32xf32>, vector<8x32xf32> -> vector<8x64xf32>
    %cst_33 = arith.constant dense<0.000000e+00> : vector<8x128xf32>
    %93 = tpu.matmul %92, %10, %cst_33 {dimension_numbers = #tpu.dot_dimension_numbers<[1], [0], [0], [1], [0, 0, 1, 1], [], []>} : vector<8x64xf32>, vector<64x128xf32>, vector<8x128xf32> -> vector<8x128xf32>
    %94 = vector.broadcast %11 : vector<1x128xf32> to vector<8x128xf32>
    %95 = arith.addf %93, %94 : vector<8x128xf32>
    %c0_34 = arith.constant 0 : index
    %c0_35 = arith.constant 0 : index
    %96 = vector.load %arg5[%c0_34, %c0_35] : memref<8x128xf32, #tpu.memory_space<vmem>>, vector<8x128xf32>
    tpu.vector_store %arg5[%c0_34, %c0_35], %95 {strides = array<i32>} : memref<8x128xf32, #tpu.memory_space<vmem>>, vector<8x128xf32>,
    return
  }
}

</mosaic_0001>

<bundles_post_ra>
// kernel: _forward_impl.1
= control target key start
LH: loop header
LB: loop body
LE: loop exit
PB: predicated region body
PF: predicated region fallthrough
CT: control target
= control target key end

     0   :  { %v861_v3 = vmov 0   ;;  %v862_v53 = vmov 0.0   ;;  %vm863_vm0 = vmmov 0   ;;  %v83_v54 = vlaneseq  ;;  %s865_s25 = smov 32   ;;  %s866_s26 = smov 96   ;;  %s1144_s3 = inlined_call_operand.vmem [shape: f32[352,32], index: 3, kind: input, shape index: {}]   ;;  %s1145_s0 = inlined_call_operand.vmem [shape: f32[8,256], index: 0, kind: input, shape index: {}]   ;;  %s1146_s1 = inlined_call_operand.vmem [shape: s32[16,1], index: 1, kind: input, shape index: {}]   ;;  %s1147_s2 = inlined_call_operand.vmem [shape: f32[8,16], index: 2, kind: input, shape index: {}]   ;;  %s1148_s4 = inlined_call_operand.vmem [shape: f32[65,192], index: 4, kind: input, shape index: {}]   ;;  %s1149_s5 = inlined_call_operand.vmem [shape: f32[8,128], index: 5, kind: output, shape index: {}]  }
   0x1   :  { %v36_v0 = vld [vmem:[%s1144_s3 + $0x80] sm:$0xff]  ;;  %v37_v1 = vld [vmem:[%s1144_s3 + $0x88] sm:$0xff]  ;;  %852 = vset.pattern.permute.xlu0 %v861_v3  ;;  %v38_v6 = vld [vmem:[%s1144_s3 + $0x90] sm:$0xff]  ;;  %702 = vmatprep.subr.mxu1 %v862_v53  ;;  %vm157_vm2 = vcmask 64512   ;;  %vm272_vm3 = vcmask 523264   ;;  %vm355_vm5 = vcmask 130048  }
   0x2   :  { %v20_v2 = vld [vmem:[%s1144_s3] sm:$0xff]  ;;  %v771_v4 = vpack.c.bf16 %v37_v1, %v36_v0  ;;  %v21_v5 = vld [vmem:[%s1144_s3 + $0x8] sm:$0xff]  ;;  %v39_v7 = vld [vmem:[%s1144_s3 + $0x98] sm:$0xff]  ;;  %704 = vmatprep.mubr.msk.f32.mxu1 %vm863_vm0, %v862_v53  ;;  %v1010_v55 = vshrl.u32 %v83_v54, 7  ;;  %v257_v58 = vand.u32 127, %v83_v54  ;;  %vm231_vm6 = vcmask 261120  }
   0x3   :  { %v773_v8 = vpack.c.bf16 %v21_v5, %v20_v2  ;;  %v775_v9 = vpack.c.bf16 %v39_v7, %v38_v6  ;;  %v22_v10 = vld [vmem:[%s1144_s3 + $0x10] sm:$0xff]  ;;  %v23_v11 = vld [vmem:[%s1144_s3 + $0x18] sm:$0xff]  ;;  %v40_v12 = vld [vmem:[%s1144_s3 + $0xa0] sm:$0xff] }
   0x4   :  { %772 = vmatprep.subr.bf16.mxu0 %v771_v4  ;;  %v41_v13 = vld [vmem:[%s1144_s3 + $0xa8] sm:$0xff]  ;;  %v777_v14 = vpack.c.bf16 %v23_v11, %v22_v10  ;;  %v24_v16 = vld [vmem:[%s1144_s3 + $0x20] sm:$0xff]  ;;  %v42_v18 = vld [vmem:[%s1144_s3 + $0xb0] sm:$0xff]  ;;  %v85_v56 = vsub.s32 0, %v1010_v55 }
   0x5   :  { %774 = vmatpush3.bf16.msra.mxu0 %v773_v8  ;;  %v779_v15 = vpack.c.bf16 %v41_v13, %v40_v12  ;;  %v25_v17 = vld [vmem:[%s1144_s3 + $0x28] sm:$0xff]  ;;  %v43_v19 = vld [vmem:[%s1144_s3 + $0xb8] sm:$0xff]  ;;  %v26_v22 = vld [vmem:[%s1144_s3 + $0x30] sm:$0xff] }
   0x6   :  { %776 = vmatprep.subr.bf16.mxu0 %v775_v9  ;;  %v781_v20 = vpack.c.bf16 %v25_v17, %v24_v16  ;;  %v783_v21 = vpack.c.bf16 %v43_v19, %v42_v18  ;;  %v27_v23 = vld [vmem:[%s1144_s3 + $0x38] sm:$0xff]  ;;  %v44_v24 = vld [vmem:[%s1144_s3 + $0xc0] sm:$0xff]  ;;  %v45_v25 = vld [vmem:[%s1144_s3 + $0xc8] sm:$0xff]  ;;  %v864_v17 = vmov 0.0|0.0  }
   0x7   :  { %v82_v26 = vld [vmem:[%s1145_s0 + $0x8] sm:$0xff]  ;;  %v258_v27 = vld [vmem:[%s1146_s1] sm:$0xff]  ;;  %v785_v28 = vpack.c.bf16 %v27_v23, %v26_v22  ;;  %v787_v29 = vpack.c.bf16 %v45_v25, %v44_v24  ;;  %v46_v33 = vld [vmem:[%s1144_s3 + $0xd0] sm:$0xff] }
   0x8   :  { %151 = vmatprep.mubr.f32.mxu0 %v82_v26  ;;  %261 = vperm.xlu0 %852, %v258_v27   ;;  %v28_v30 = vld [vmem:[%s1144_s3 + $0x40] sm:$0xff]  ;;  %v29_v31 = vld [vmem:[%s1144_s3 + $0x48] sm:$0xff]  ;;  %v47_v34 = vld [vmem:[%s1144_s3 + $0xd8] sm:$0xff] }
   0x9   :  { %778 = vmatpush3.bf16.msra.mxu0 %v777_v14  ;;  %v259_v32 = vld [vmem:[%s1146_s1 + $0x8] sm:$0xff]  ;;  %v789_v35 = vpack.c.bf16 %v29_v31, %v28_v30  ;;  %v791_v36 = vpack.c.bf16 %v47_v34, %v46_v33  ;;  %v30_v37 = vld [vmem:[%s1144_s3 + $0x50] sm:$0xff]  ;;  %v31_v38 = vld [vmem:[%s1144_s3 + $0x58] sm:$0xff] }
   0xa   :  { %780 = vmatprep.subr.bf16.mxu0 %v779_v15  ;;  %v48_v39 = vld [vmem:[%s1144_s3 + $0xe0] sm:$0xff]  ;;  %v49_v40 = vld [vmem:[%s1144_s3 + $0xe8] sm:$0xff]  ;;  %v793_v41 = vpack.c.bf16 %v31_v38, %v30_v37  ;;  %v50_v45 = vld [vmem:[%s1144_s3 + $0xf0] sm:$0xff] }
   0xb   :  { %v795_v42 = vpack.c.bf16 %v49_v40, %v48_v39  ;;  %v32_v43 = vld [vmem:[%s1144_s3 + $0x60] sm:$0xff]  ;;  %v33_v44 = vld [vmem:[%s1144_s3 + $0x68] sm:$0xff]  ;;  %v51_v46 = vld [vmem:[%s1144_s3 + $0xf8] sm:$0xff] }
   0xc   :  { %264 = vperm.xlu0 %852, %v259_v32   ;;  %v797_v47 = vpack.c.bf16 %v33_v44, %v32_v43  ;;  %v799_v48 = vpack.c.bf16 %v51_v46, %v50_v45  ;;  %v34_v49 = vld [vmem:[%s1144_s3 + $0x70] sm:$0xff]  ;;  %v35_v50 = vld [vmem:[%s1144_s3 + $0x78] sm:$0xff]  ;;  %v81_v52 = vld [vmem:[%s1145_s0] sm:$0xff] }
   0xd   :  { %782 = vmatpush3.bf16.msra.mxu0 %v781_v20  ;;  %v801_v51 = vpack.c.bf16 %v35_v50, %v34_v49  ;;  %v1016_v57 = vld [vmem:[%s1144_s3 + $0x150] sm:$0xff]  ;;  %v52_v61 = vld [vmem:[%s1144_s3 + $0x100] sm:$0xff]  ;;  %v53_v62 = vld [vmem:[%s1144_s3 + $0x108] sm:$0xff] }
   0xe   :  { %784 = vmatprep.subr.bf16.mxu0 %v783_v21  ;;  %v86_v60 = vrot.slane %v1016_v57, %v85_v56  ;;  %v54_v2 = vld [vmem:[%s1144_s3 + $0x110] sm:$0xff]  ;;  %v55_v3 = vld [vmem:[%s1144_s3 + $0x118] sm:$0xff]  ;;  %v803_v4 = vpack.c.bf16 %v53_v62, %v52_v61  ;;  %v56_v9 = vld [vmem:[%s1144_s3 + $0x120] sm:$0xff] }
   0xf   :  { %v63_v6 = vld [vmem:[%s1144_s3 + $0x158] sm:$0xff]  ;;  %v807_v7 = vpack.c.bf16 %v55_v3, %v54_v2  ;;  %v57_v10 = vld [vmem:[%s1144_s3 + $0x128] sm:$0xff]  ;;  %v58_v12 = vld [vmem:[%s1144_s3 + $0x130] sm:$0xff] }
  0x10   :  { %v811_v11 = vpack.c.bf16 %v57_v10, %v56_v9  ;;  %v59_v13 = vld [vmem:[%s1144_s3 + $0x138] sm:$0xff]  ;;  %v61_v20 = vld [vmem:[%s1144_s3 + $0x148] sm:$0xff]  ;;  %v60_v21 = vld [vmem:[%s1144_s3 + $0x140] sm:$0xff]  ;;  %v253_v10 = vsub.s32 2, %v1010_v55 }
  0x11   :  { %786 = vmatpush3.bf16.msra.mxu0 %v785_v28  ;;  %v815_v14 = vpack.c.bf16 %v59_v13, %v58_v12  ;;  %v354_v27 = vld [vmem:[%s1147_s2] sm:$0xff]  ;;  %v74_v43 = vld [vmem:[%s1148_s4 + $0x18] sm:$0xff]  ;;  %v75_v44 = vld [vmem:[%s1148_s4 + $0x28] sm:$0xff] }
  0x12   :  { %788 = vmatprep.subr.bf16.mxu0 %v787_v29  ;;  %v76_v46 = vld [vmem:[%s1148_s4 + $0x38] sm:$0xff]  ;;  %v254_v12 = vrot.slane %v1016_v57, %v253_v10 }
  0x13   :  { %v78_v49 = vld [vmem:[%s1148_s4 + $0x58] sm:$0xff] }
  0x15   :  { %790 = vmatpush3.bf16.msra.mxu0 %v789_v35 }
  0x16   :  { %792 = vmatprep.subr.bf16.mxu0 %v791_v36 }
  0x19   :  { %794 = vmatpush3.bf16.msra.mxu0 %v793_v41 }
  0x1a   :  { %796 = vmatprep.subr.bf16.mxu0 %v795_v42  ;;  %v73_v42 = vld [vmem:[%s1148_s4 + $0x8] sm:$0xff] }
  0x1b   :  { %v823_v45 = vpack.c.bf16 %v74_v43, %v73_v42  ;;  %v72_v42 = vld [vmem:[%s1148_s4 + $0x80] ss:$0 sm:$0xff] }
  0x1d   :  { %798 = vmatpush3.bf16.msra.mxu0 %v797_v47  ;;  %v826_v47 = vpack.c.bf16 %v76_v46, %v75_v44 }
  0x1e   :  { %800 = vmatprep.subr.bf16.mxu0 %v799_v48  ;;  %v77_v48 = vld [vmem:[%s1148_s4 + $0x48] sm:$0xff] }
  0x1f   :  { %v829_v50 = vpack.c.bf16 %v78_v49, %v77_v48 }
  0x21   :  { %802 = vmatpush3.bf16.msra.mxu0 %v801_v51  ;;  %v79_v51 = vld [vmem:[%s1148_s4 + $0x68] sm:$0xff] }
  0x22   :  { %834 = vmatprep.subr.bf16.mxu0 %v864_v17 }
  0x24   :  { %152 = vmatmul.mubr.f32.vlgmr.msra.gmra.mrb[0].mxu0 %v81_v52  ;;  %v80_v52 = vld [vmem:[%s1148_s4 + $0x78] sm:$0xff] }
  0x25   :  { %768 = vmatprep.mubr.msk.f32.mxu0 %vm863_vm0, %v862_v53 }
  0x87   :  { %v262_v0 = vpop.permute.xlu0 %261 }
  0x88   :  { %vm266_vm1 = vcmp.eq.s32.totalorder %v257_v58, %v262_v0 }
  0x89   :  { %v627_v8 = vsel %vm266_vm1, 1.0, %v862_v53 }
  0x8b   :  { %v265_v15 = vpop.permute.xlu0 %264 }
  0x8c   :  { %vm267_vm4 = vcmp.eq.s32.totalorder %v257_v58, %v265_v15 }
  0x8d   :  { %v628_v16 = vsel %vm267_vm4, 1.0, %v862_v53 }
  0xf7   :  { %v666_v59 = vpop.f32.mrb[0].mxu0 }
  0xf8   :  { %v667_v63 = vpop.f32.mrb[1].mxu0 }
  0xf9   :  { %v668_v1 = vadd.f32 %v667_v63, %v666_v59  ;;  %v444_v59 = vsub.s32 3, %v1010_v55 }
  0xfb   :  { %v154_v5 = vadd.f32 %v668_v1, %v86_v60  ;;  %v449_v60 = vsub.s32 4, %v1010_v55  ;;  %v445_v61 = vrot.slane %v1016_v57, %v444_v59 }
  0xfd   :  { %703 = vmatpush3.msra.mxu1 %v154_v5  ;;  %v450_v0 = vrot.slane %v1016_v57, %v449_v60 }
  0xfe   :  { %705 = vmatmul.mubr.msk.f32.vlgmr.msra.gmra.mrb[0].mxu1 %vm157_vm2, %v63_v6  ;;  %804 = vmatprep.subr.bf16.mxu1 %v803_v4  ;;  %v248_v6 = vsub.s32 1, %v1010_v55 }
  0xff   :  { %806 = vmatpush3.bf16.msra.mxu1 %v803_v4  ;;  %723 = vmatprep.mubr.msk.f32.mxu1 %vm272_vm3, %v627_v8 }
 0x100   :  { %808 = vmatprep.subr.bf16.mxu1 %v807_v7  ;;  %v249_v9 = vrot.slane %v1016_v57, %v248_v6  ;;  %v64_v57 = vld [vmem:[%s1148_s4] sm:$0xff] }
 0x103   :  { %810 = vmatpush3.bf16.msra.mxu1 %v807_v7 }
 0x104   :  { %812 = vmatprep.subr.bf16.mxu1 %v811_v11 }
 0x107   :  { %814 = vmatpush3.bf16.msra.mxu1 %v811_v11 }
 0x108   :  { %816 = vmatprep.subr.bf16.mxu1 %v815_v14 }
 0x10b   :  { %818 = vmatpush3.bf16.msra.mxu1 %v815_v14 }
 0x10c   :  { %819 = vmatprep.subr.bf16.mxu1 %v864_v17 }
 0x10e   :  { %724 = vmatmul.mubr.msk.f32.vlgmr.msra.gmra.mrb[2].mxu1 %vm272_vm3, %v628_v16 }
 0x10f   :  { %730 = vmatprep.mubr.msk.f32.mxu1 %vm863_vm0, %v862_v53 }
 0x1d1   :  { %v227_v18 = vpop.f32.mrb[0].mxu1 }
 0x1d2   :  { %v706_v19 = vpop.f32.mrb[1].mxu1  ;;  %v232_v31 = vsel %vm231_vm6, %v227_v18, 0.0 }
 0x1e1   :  { %v725_v22 = vpop.f32.mrb[2].mxu1 }
 0x1e2   :  { %v351_v23 = vadd.f32 %v725_v22, %v61_v20  ;;  %v345_v24 = vpop.f32.mrb[3].mxu1  ;;  %v65_v22 = vld [vmem:[%s1148_s4 + $0x10] sm:$0xff] }
 0x1e3   :  { %v346_v25 = vadd.f32 %v345_v24, %v60_v21  ;;  %v66_v24 = vld [vmem:[%s1148_s4 + $0x20] sm:$0xff] }
 0x1e5   :  { %v820_v26 = vpack.c.bf16 %v351_v23, %v346_v25  ;;  %v835_v23 = vpack.c.bf16 %v65_v22, %v64_v57  ;;  %v67_v25 = vld [vmem:[%s1148_s4 + $0x30] sm:$0xff] }
 0x1e7   :  { %821 = vmatpush3.bf16.msra.mxu1 %v820_v26  ;;  %836 = vmatpush3.bf16.msra.mxu0 %v835_v23  ;;  %v68_v26 = vld [vmem:[%s1148_s4 + $0x40] sm:$0xff] }
 0x1e8   :  { %822 = vmatprep.subr.bf16.mxu1 %v864_v17  ;;  %837 = vmatprep.subr.bf16.mxu0 %v864_v17 }
 0x1ea   :  { %731 = vmatmul.mubr.msk.f32.vlgmr.msra.gmra.mrb[4].mxu1 %vm355_vm5, %v354_v27  ;;  %v838_v27 = vpack.c.bf16 %v67_v25, %v66_v24 }
 0x1eb   :  { %749 = vmatprep.mubr.msk.f32.mxu1 %vm863_vm0, %v862_v53  ;;  %824 = vmatpush3.bf16.msra.mxu1 %v823_v45  ;;  %v832_v53 = vpack.c.bf16 %v80_v52, %v79_v51 }
 0x1ec   :  { %825 = vmatprep.subr.bf16.mxu1 %v864_v17  ;;  %839 = vmatpush3.bf16.msra.mxu0 %v838_v27 }
 0x1ed   :  { %840 = vmatprep.subr.bf16.mxu0 %v864_v17 }
 0x1ef   :  { %827 = vmatpush3.bf16.msra.mxu1 %v826_v47 }
 0x1f0   :  { %828 = vmatprep.subr.bf16.mxu1 %v864_v17 }
 0x1f3   :  { %830 = vmatpush3.bf16.msra.mxu1 %v829_v50 }
 0x1f4   :  { %831 = vmatprep.subr.bf16.mxu1 %v864_v17 }
 0x1f7   :  { %833 = vmatpush3.bf16.msra.mxu1 %v832_v53 }
 0x2bd   :  { %v425_v28 = vpop.f32.mrb[4].mxu1 }
 0x2be   :  { %v732_v29 = vpop.f32.mrb[5].mxu1  ;;  %v429_v30 = vsel %vm231_vm6, %v425_v28, 0.0 }
 0x2bf   :  { %430 = vadd.xlane.f32.xlu1 %v429_v30  ;;  %v70_v30 = vld [vmem:[%s1148_s4 + $0x60] sm:$0xff] }
 0x2c3   :  { %233 = vadd.xlane.f32.xlu1 %v232_v31  ;;  %v71_v31 = vld [vmem:[%s1148_s4 + $0x70] sm:$0xff] }
 0x34c   :  { %v431_v32 = vpop.xlane.xlu1 %430 }
 0x34d   :  { %v432_v33 = vmul.f32 0.03125, %v431_v32  ;;  %v844_v32 = vpack.c.bf16 %v71_v31, %v70_v30 }
 0x34f   :  { %v433_v34 = vsub.f32 %v425_v28, %v432_v33  ;;  %v69_v28 = vld [vmem:[%s1148_s4 + $0x50] sm:$0xff] }
 0x350   :  { %v234_v35 = vpop.xlane.xlu1 %233  ;;  %v841_v29 = vpack.c.bf16 %v69_v28, %v68_v26 }
 0x351   :  { %v236_v36 = vmul.f32 0.03125, %v234_v35  ;;  %v434_v37 = vmul.f32 %v433_v34, %v433_v34 }
 0x352   :  { %842 = vmatpush3.bf16.msra.mxu0 %v841_v29 }
 0x353   :  { %v237_v38 = vsub.f32 %v227_v18, %v236_v36  ;;  %v435_v39 = vsel %vm231_vm6, %v434_v37, 0.0  ;;  %843 = vmatprep.subr.bf16.mxu0 %v864_v17 }
 0x354   :  { %436 = vadd.xlane.f32.xlu0 %v435_v39 }
 0x355   :  { %v238_v40 = vmul.f32 %v237_v38, %v237_v38 }
 0x356   :  { %845 = vmatpush3.bf16.msra.mxu0 %v844_v32 }
 0x357   :  { %v239_v41 = vsel %vm231_vm6, %v238_v40, 0.0 }
 0x358   :  { %240 = vadd.xlane.f32.xlu1 %v239_v41 }
 0x3e1   :  { %v437_v54 = vpop.xlane.xlu0 %436 }
 0x3e2   :  { %v438_v56 = vmul.f32 0.03125, %v437_v54 }
 0x3e4   :  { %v439_v58 = vadd.f32 1e-05, %v438_v56 }
 0x3e5   :  { %v241_v3 = vpop.xlane.xlu1 %240 }
 0x3e6   :  { %853 = vrsqrt.f32 %v439_v58  ;;  %v242_v4 = vmul.f32 0.03125, %v241_v3 }
 0x3e8   :  { %v243_v5 = vadd.f32 1e-05, %v242_v4 }
 0x3ea   :  { %855 = vrsqrt.f32 %v243_v5 }
 0x3f0   :  { %v854_v62 = vpop.eup %853 }
 0x3f1   :  { %v441_v63 = vmul.f32 %v854_v62, %v433_v34 }
 0x3f3   :  { %v446_v1 = vmul.f32 %v445_v61, %v441_v63 }
 0x3f4   :  { %v856_v7 = vpop.eup %855 }
 0x3f5   :  { %v451_v2 = vadd.f32 %v450_v0, %v446_v1  ;;  %v245_v8 = vmul.f32 %v856_v7, %v237_v38 }
 0x3f7   :  { %453 = vrot.lane.b32.xlu1 %v451_v2, %s865_s25  ;;  %v250_v11 = vmul.f32 %v249_v9, %v245_v8 }
 0x3f9   :  { %v255_v13 = vadd.f32 %v254_v12, %v250_v11 }
 0x469   :  { %v454_v14 = vpop.permute.xlu1 %453 }
 0x46a   :  { %v456_v15 = vsel %vm231_vm6, %v255_v13, %v454_v14 }
 0x46b   :  { %750 = vmatmul.mubr.msk.f32.vlgmr.msra.gmra.mrb[6].mxu1 %vm272_vm3, %v456_v15 }
 0x53e   :  { %v526_v16 = vpop.f32.mrb[6].mxu1 }
 0x53f   :  { %v530_v18 = vmul.f32 %v526_v16, %v526_v16  ;;  %v751_v19 = vpop.f32.mrb[7].mxu1 }
 0x541   :  { %538 = vrot.lane.b32.xlu1 %v530_v18, %s866_s26  ;;  %v531_v20 = vsel %vm231_vm6, %v530_v18, 0.0 }
 0x565   :  { %532 = vadd.xlane.f32.xlu1 %v531_v20 }
 0x5b3   :  { %v539_v21 = vpop.permute.xlu1 %538 }
 0x5b4   :  { %v541_v55 = vsel %vm231_vm6, %v539_v21, 0.0 }
 0x5b5   :  { %542 = vadd.xlane.f32.xlu0 %v541_v55 }
 0x5f2   :  { %v533_v33 = vpop.xlane.xlu1 %532 }
 0x5f3   :  { %v534_v34 = vmax.f32 %v533_v33, 1e-12 }
 0x5f5   :  { %857 = vrsqrt.f32 %v534_v34 }
 0x5ff   :  { %v858_v37 = vpop.eup %857 }
 0x600   :  { %v536_v39 = vmul.f32 %v858_v37, %v526_v16 }
 0x642   :  { %v543_v35 = vpop.xlane.xlu0 %542 }
 0x643   :  { %v544_v36 = vmax.f32 %v543_v35, 1e-12 }
 0x645   :  { %859 = vrsqrt.f32 %v544_v36 }
 0x64f   :  { %v860_v38 = vpop.eup %859 }
 0x650   :  { %v546_v40 = vmul.f32 %v860_v38, %v526_v16 }
 0x652   :  { %v547_v41 = vsel %vm231_vm6, %v536_v39, %v546_v40 }
 0x653   :  { %769 = vmatmul.mubr.msk.f32.vlgmr.msra.gmra.mrb[2].mxu0 %vm272_vm3, %v547_v41 }
 0x726   :  { %v617_v17 = vpop.f32.mrb[2].mxu0 }
 0x727   :  { %v618_v43 = vadd.f32 %v617_v17, %v72_v42  ;;  %v770_v44 = vpop.f32.mrb[3].mxu0 }
 0x729   :  { %621 = vst [vmem:[%s1149_s5] sm:$0xff] %v618_v43 }

</bundles_post_ra>
